<compile_context>
chip_gen: v7x
topology: tpu7x:2x2x1
jax: 0.10.0
libtpu: 0.0.40
codegen_flags: <defaults>
</compile_context>

<pallas_src>
import functools

import jax
import jax.numpy as jnp
from jax.experimental import pallas as pl
from jax.experimental.pallas import tpu as pltpu

RRELU_LOWER = 1.0 / 8.0
RRELU_UPPER = 1.0 / 3.0
RRELU_SLOPE = (RRELU_LOWER + RRELU_UPPER) / 2.0  # 11/48 — eval-mode F.rrelu slope


def _round_up(x: int, m: int) -> int:
    return (x + m - 1) // m * m


# ---------------------------------------------------------------------------
# Kernel
# ---------------------------------------------------------------------------
def _ind_student_kernel(x_ref, w_ref, b_ref, o_ref):
    # x_ref: (TB, K) f32, w_ref: (K, TN) bf16, b_ref: (1, TN) f32, o_ref: (TB, TN) f32
    x = x_ref[...].astype(w_ref.dtype)  # cheap VPU cast -> native bf16 MXU path
    y = jnp.dot(x, w_ref[...], preferred_element_type=jnp.float32)
    y = y + b_ref[...]                  # bias broadcast over the batch tile (f32)
    # eval-mode rrelu == leaky-relu(11/48); slope < 1 so max(y, y*slope) is exact
    o_ref[...] = jnp.maximum(y, y * RRELU_SLOPE).astype(o_ref.dtype)


# ---------------------------------------------------------------------------
# One-time parameter prep (hoisted out of the per-call path)
# ---------------------------------------------------------------------------
def prepare_ind_student_params(w1, b1, *, weight_dtype=jnp.bfloat16):
    """w1: (emb_dim, input_dim) PyTorch Linear weight, b1: (emb_dim,).

    Returns (w_p, b_p, emb_dim): W transposed to (input_dim, N_pad) in
    `weight_dtype`, bias as (1, N_pad) float32, with N padded once to a
    multiple of 128 for lane-dense MXU tiles / unmasked stores.  Padded
    columns have weight 0 and bias 0 and are sliced off after the kernel,
    so results are exact.
    """
    emb_dim, input_dim = w1.shape
    n_pad = _round_up(emb_dim, 128)
    w_t = jnp.asarray(w1).T.astype(weight_dtype)      # (K, N)
    b = jnp.asarray(b1).astype(jnp.float32)
    if n_pad != emb_dim:
        w_p = jnp.zeros((input_dim, n_pad), weight_dtype).at[:, :emb_dim].set(w_t)
        b_p = jnp.zeros((1, n_pad), jnp.float32).at[0, :emb_dim].set(b)
    else:
        w_p = w_t
        b_p = b.reshape(1, n_pad)
    return w_p, b_p, emb_dim


# ---------------------------------------------------------------------------
# Tile sizing from per-chip VMEM
# ---------------------------------------------------------------------------
def _vmem_budget_bytes() -> int:
    try:
        cap = int(pltpu.get_tpu_info().vmem_capacity_bytes)
    except Exception:
        cap = 64 << 20  # conservative fallback = v7x per-core VMEM
    # ~100 MiB cap on v5e/v6e (128 MiB physical); ~0.8x capacity on v7x.
    return min(int(cap * 0.8), 100 << 20)


def _choose_tiles(B, K, n_pad, x_bytes, w_bytes, o_bytes, budget):
    # The auto-pipeline allocates 2 buffers per operand even for constant
    # index_maps, so budget 2x everything; reserve ~2 MiB for internal scratch.
    usable = max(budget - (2 << 20), 4 << 20)

    # TN: largest 128-multiple divisor of n_pad whose double-buffered weight
    # block uses at most ~half the budget (keeps room for x / out tiles).
    tn = n_pad
    while tn > 128 and 2 * K * tn * w_bytes > usable // 2:
        cand = tn - 128
        while cand > 128 and n_pad % cand != 0:
            cand -= 128
        tn = cand

    # TB: spend what's left on double-buffered x and out tiles.
    left = max(usable - 2 * K * tn * w_bytes - 2 * tn * 4, 0)
    per_row = 2 * (K * x_bytes + tn * o_bytes)
    sub = 16 if x_bytes == 2 else 8          # bf16 inputs pack 2 rows / sublane
    tb = max(sub, min(1024, left // max(per_row, 1)))
    tb = (tb // sub) * sub
    tb = max(sub, min(tb, _round_up(B, sub)))  # never larger than the batch
    return int(tb), int(tn)


# ---------------------------------------------------------------------------
# Forward
# ---------------------------------------------------------------------------
@functools.partial(jax.jit, static_argnames=("emb_dim",))
def ind_student_forward(x, w_p, b_p, *, emb_dim):
    """forward(x) = eval-mode rrelu(x @ W1.T + b1).

    x: (B, input_dim) float32, used as-is (no HBM padding copy).
    w_p, b_p: outputs of prepare_ind_student_params (prepped once at init).
    """
    B, K = x.shape
    K_w, n_pad = w_p.shape
    assert K == K_w, "weight/input dim mismatch"

    budget = _vmem_budget_bytes()
    tb, tn = _choose_tiles(
        B, K, n_pad,
        x_bytes=x.dtype.itemsize,
        w_bytes=w_p.dtype.itemsize,
        o_bytes=4,
        budget=budget,
    )
    num_n = n_pad // tn
    num_b = pl.cdiv(B, tb)      # ragged last batch tile -> Pallas boundary masking
    grid = (num_n, num_b)       # N outer (each W block loaded once), batch inner

    cost = pl.CostEstimate(
        flops=2 * B * K * n_pad,
        transcendentals=0,
        bytes_accessed=(B * K * x.dtype.itemsize * num_n
                        + K * n_pad * w_p.dtype.itemsize
                        + n_pad * 4
                        + B * n_pad * 4),
    )

    out_p = pl.pallas_call(
        _ind_student_kernel,
        out_shape=jax.ShapeDtypeStruct((B, n_pad), jnp.float32),
        grid=grid,
        in_specs=[
            # x: tiled over batch (inner axis); full unpadded K as the lane dim.
            pl.BlockSpec((tb, K), lambda j, i: (i, 0)),
            # W: one (K, TN) column block per outer step; constant along the
            # inner batch axis, so it is fetched once and stays resident.
            pl.BlockSpec((K, tn), lambda j, i: (0, j)),
            pl.BlockSpec((1, tn), lambda j, i: (0, j)),
        ],
        out_specs=pl.BlockSpec((tb, tn), lambda j, i: (i, j)),
        compiler_params=pltpu.CompilerParams(
            dimension_semantics=("parallel", "parallel"),
            vmem_limit_bytes=budget,
        ),
        cost_estimate=cost,
    )(x, w_p, b_p)

    if n_pad != emb_dim:
        out_p = out_p[:, :emb_dim]   # strip the once-padded output features
    return out_p


# ---------------------------------------------------------------------------
# Demo / self-test
# ---------------------------------------------------------------------------
if __name__ == "__main__":
    # Small shapes consistent with the module: x is (batch, input_dim).
    batch, input_dim, emb_dim = 8, 32, 32

    key = jax.random.PRNGKey(0)
    kx, kw1, kb1 = jax.random.split(key, 3)

    x = jax.random.normal(kx, (batch, input_dim), dtype=jnp.float32)

    # Deterministic synthetic Linear1 parameters, PyTorch-style uniform init.
    bound = 1.0 / jnp.sqrt(jnp.float32(input_dim))
    w1 = jax.random.uniform(kw1, (emb_dim, input_dim), jnp.float32, -bound, bound)
    b1 = jax.random.uniform(kb1, (emb_dim,), jnp.float32, -bound, bound)
    # Linear2 exists in __init__ but is unused in forward; not computed.

    # One-time parameter prep (transpose + pad + bf16 cast), outside the hot path.
    w_p, b_p, n_out = prepare_ind_student_params(w1, b1)

    out = ind_student_forward(x, w_p, b_p, emb_dim=n_out)
    out = jax.block_until_ready(out)

    # Reference in plain f32 JAX (Linear + eval-mode rrelu).  Tolerance is
    # loosened because the kernel uses bf16 weights on the MXU.
    ref = x @ w1.T + b1
    ref = jnp.where(ref >= 0, ref, ref * RRELU_SLOPE)
    assert out.shape == ref.shape, "shape mismatch vs reference"
    assert jnp.allclose(out, ref, atol=2e-2, rtol=2e-2), "mismatch vs reference"

    print("KERNEL_OK")
</pallas_src>

<mosaic_0001>
module attributes {stable_mosaic.version = 11 : i64} {
  func.func @_ind_student_kernel(%arg0: i32, %arg1: i32, %arg2: memref<8x32xf32, #tpu.memory_space<vmem>>, %arg3: memref<32x128xbf16, #tpu.memory_space<vmem>>, %arg4: memref<1x128xf32, #tpu.memory_space<vmem>>, %arg5: memref<8x128xf32, #tpu.memory_space<vmem>>) attributes {dimension_semantics = [#tpu.dimension_semantics<parallel>, #tpu.dimension_semantics<parallel>], iteration_bounds = array<i64: 1, 1>, scalar_prefetch = 0 : i64, scratch_operands = 0 : i64, tpu.core_type = #tpu.core_type<tc>, window_params = [{transform_indices = @transform_0, window_bounds = array<i64: 8, 32>}, {transform_indices = @transform_1, window_bounds = array<i64: 32, 128>}, {transform_indices = @transform_2, window_bounds = array<i64: 1, 128>}, {transform_indices = @transform_3, window_bounds = array<i64: 8, 128>}]} {
    %c0 = arith.constant 0 : index
    %c0_0 = arith.constant 0 : index
    %0 = vector.load %arg2[%c0, %c0_0] : memref<8x32xf32, #tpu.memory_space<vmem>>, vector<8x32xf32>
    %1 = arith.truncf %0 : vector<8x32xf32> to vector<8x32xbf16>
    %c0_1 = arith.constant 0 : index
    %c0_2 = arith.constant 0 : index
    %2 = vector.load %arg3[%c0_1, %c0_2] : memref<32x128xbf16, #tpu.memory_space<vmem>>, vector<32x128xbf16>
    %cst = arith.constant dense<0.000000e+00> : vector<8x128xf32>
    %3 = tpu.matmul %1, %2, %cst {dimension_numbers = #tpu.dot_dimension_numbers<[1], [0], [0], [1], [0, 0, 1, 1], [], []>} : vector<8x32xbf16>, vector<32x128xbf16>, vector<8x128xf32> -> vector<8x128xf32>
    %c0_3 = arith.constant 0 : index
    %c0_4 = arith.constant 0 : index
    %4 = vector.load %arg4[%c0_3, %c0_4] : memref<1x128xf32, #tpu.memory_space<vmem>>, vector<1x128xf32>
    %5 = vector.broadcast %4 : vector<1x128xf32> to vector<8x128xf32>
    %6 = arith.addf %3, %5 : vector<8x128xf32>
    %cst_5 = arith.constant 0.229166672 : f32
    %7 = vector.broadcast %cst_5 : f32 to vector<8x128xf32>
    %8 = arith.mulf %6, %7 : vector<8x128xf32>
    %9 = arith.maximumf %6, %8 : vector<8x128xf32>
    %c0_6 = arith.constant 0 : index
    %c0_7 = arith.constant 0 : index
    %10 = vector.load %arg5[%c0_6, %c0_7] : memref<8x128xf32, #tpu.memory_space<vmem>>, vector<8x128xf32>
    tpu.vector_store %arg5[%c0_6, %c0_7], %9 {strides = array<i32>} : memref<8x128xf32, #tpu.memory_space<vmem>>, vector<8x128xf32>,
    return
  }
  func.func @transform_0(%arg0: i32, %arg1: i32) -> (i32, i32) {
    %c0_i32 = arith.constant 0 : i32
    %c0_i32_0 = arith.constant 0 : i32
    return %arg1, %c0_i32 : i32, i32
  }
  func.func @transform_1(%arg0: i32, %arg1: i32) -> (i32, i32) {
    %c0_i32 = arith.constant 0 : i32
    %c0_i32_0 = arith.constant 0 : i32
    return %c0_i32, %arg0 : i32, i32
  }
  func.func @transform_2(%arg0: i32, %arg1: i32) -> (i32, i32) {
    %c0_i32 = arith.constant 0 : i32
    %c0_i32_0 = arith.constant 0 : i32
    return %c0_i32, %arg0 : i32, i32
  }
  func.func @transform_3(%arg0: i32, %arg1: i32) -> (i32, i32) {
    %c0_i32 = arith.constant 0 : i32
    return %arg1, %arg0 : i32, i32
  }
}

</mosaic_0001>

<bundles_post_ra>
// kernel: ind_student_forward.1
= control target key start
LH: loop header
LB: loop body
LE: loop exit
PB: predicated region body
PF: predicated region fallthrough
CT: control target
= control target key end

     0   :  { %8 = vsyncpa [#allocation3], 0  ;;  %s299_s0 = inlined_call_operand.hbm [shape: f32[8,32], index: 0, kind: input, shape index: {}]   ;;  %s300_s1 = inlined_call_operand.hbm [shape: bf16[32,128], index: 1, kind: input, shape index: {}]   ;;  %s301_s2 = inlined_call_operand.vmem [shape: f32[1,128], index: 2, kind: input, shape index: {}]   ;;  %s302_s3 = inlined_call_operand.hbm [shape: f32[8,128], index: 3, kind: output, shape index: {}]  }
   0x1   :  { %9 = vsyncpa [#allocation6], 0 }
   0x2   :  { %10 = vsyncpa [#allocation4], 0  ;;  %s226_s12 = smov [#allocation2]   ;;  %s227_s14 = smov [#allocation5]  }
   0x3   :  { %s17_s13 = sshll.u32 %s226_s12, 4  ;;  %s26_s15 = sshll.u32 %s227_s14, 4  ;;  %s18_s13 = int_to_ptr.vmem [resolvable:$true] %s17_s13  ;;  %s253_s15 = int_to_ptr.vmem [resolvable:$true] %s26_s15 }
   0x4   :  { %s154_s18 = scalar_lea.hbm %s299_s0, 128 }
   0x5   :  { %p155_p0 = scmp.ne.s32.totalorder %s299_s0, %s154_s18  ;;  %p158_p1 = scmp.lt.u32.totalorder %s154_s18, %s299_s0 }
   0x7   :  { %p160_p2 = pnand %p158_p1, %p155_p0 }
   0x9   :  { %163 = shalt.err (!%p160_p2)
}
   0xa   :  { %s164_s23 = scalar_lea.vmem %s18_s13, 128  ;;  %p169_p4 = scmp.lt.s32.totalorder %s18_s13, %s18_s13 }
   0xb   :  { %p165_p3 = scmp.ne.s32.totalorder %s18_s13, %s164_s23  ;;  %p170_p5 = scmp.lt.s32.totalorder %s164_s23, %s164_s23 }
   0xd   :  { %p171_p6 = por %p170_p5, %p169_p4 }
   0xf   :  { %p172_p7 = pnand %p171_p6, %p165_p3 }
  0x11   :  { %175 = shalt.err (!%p172_p7)
}
  0x12   :  { %20 = dma.hbm_to_vmem [thread:$0]  %s299_s0, 128, %s18_s13, [#allocation3]  }
  0x13   :  { %s176_s28 = scalar_lea.hbm %s300_s1, 256 }
  0x14   :  { %p177_p8 = scmp.ne.s32.totalorder %s300_s1, %s176_s28  ;;  %p180_p9 = scmp.lt.u32.totalorder %s176_s28, %s300_s1 }
  0x16   :  { %p182_p10 = pnand %p180_p9, %p177_p8 }
  0x18   :  { %185 = shalt.err (!%p182_p10)
}
  0x19   :  { %s186_s6 = scalar_lea.vmem %s253_s15, 256  ;;  %p191_p12 = scmp.lt.s32.totalorder %s253_s15, %s253_s15 }
  0x1a   :  { %p187_p11 = scmp.ne.s32.totalorder %s253_s15, %s186_s6  ;;  %p192_p13 = scmp.lt.s32.totalorder %s186_s6, %s186_s6 }
  0x1c   :  { %p193_p0 = por %p192_p13, %p191_p12 }
  0x1e   :  { %p194_p1 = pnand %p193_p0, %p187_p11 }
  0x20   :  { %197 = shalt.err (!%p194_p1)
}
  0x21   :  { %s228_s0 = smov 64   ;;  %s229_s7 = smov 4  }
  0x22   :  { %32 = dma.hbm_to_vmem [thread:$0]  %s300_s1, 256, %s253_s15, [#allocation6], %s228_s0, %s228_s0, %s229_s7  }
  0x23   :  { %220 = dma.done.wait [#allocation3], 128  }
  0x24   :  { %221 = vsyncadd [#allocation3], 4294967168 }
  0x25   :  { %222 = dma.done.wait [#allocation6], 256  }
  0x26   :  { %223 = vsyncadd [#allocation6], 4294967040  ;;  %v230_v0 = vmov 0.0   ;;  %vm231_vm0 = vmmov 0   ;;  %v152_v1 = vld [vmem:[#allocation5] sm:$0xff]   ;;  %v153_v2 = vld [vmem:[#allocation5 + $0x8] sm:$0xff]  }
  0x27   :  { %137 = vmatprep.subr.bf16.mxu0 %v230_v0  ;;  %141 = vmatprep.mubr.msk.bf16.mxu0 %vm231_vm0, %v230_v0  ;;  %v42_v3 = vld [vmem:[#allocation2] sm:$0xff]  ;;  %vm67_vm1 = vcmask 261120   ;;  %s232_s1 = smov [#allocation7]  }
  0x28   :  { %138 = vmatpush3.bf16.msra.mxu0 %v152_v1  ;;  %v43_v4 = vpack.c.bf16 %v42_v3, %v42_v3  ;;  %v130_v5 = vld [vmem:[%s301_s2] ss:$0 sm:$0xff]  ;;  %s120_s12 = sshll.u32 %s232_s1, 4  ;;  %s121_s12 = int_to_ptr.vmem [resolvable:$true] %s120_s12 }
  0x29   :  { %139 = vmatprep.subr.bf16.mxu0 %v230_v0  ;;  %s198_s13 = scalar_lea.vmem %s121_s12, 128  ;;  %p203_p3 = scmp.lt.s32.totalorder %s121_s12, %s121_s12 }
  0x2a   :  { %p199_p2 = scmp.ne.s32.totalorder %s121_s12, %s198_s13  ;;  %p204_p4 = scmp.lt.s32.totalorder %s198_s13, %s198_s13 }
  0x2c   :  { %140 = vmatpush3.bf16.msra.mxu0 %v153_v2  ;;  %p205_p5 = por %p204_p4, %p203_p3 }
  0x2e   :  { %p206_p6 = pnand %p205_p5, %p199_p2 }
  0x2f   :  { %142 = vmatmul.mubr.msk.bf16.vlgmr.msra.gmra.mrb[0].mxu0 %vm67_vm1, %v43_v4 }
 0x102   :  { %v105_v6 = vpop.f32.mrb[0].mxu0 }
 0x103   :  { %v106_v7 = vadd.f32 %v130_v5, %v105_v6  ;;  %v143_v8 = vpop.f32.mrb[1].mxu0 }
 0x104   :  { %v108_v9 = vpop.f32.mrb[2].mxu0 }
 0x105   :  { %v111_v10 = vmul.f32 0.22916667, %v106_v7  ;;  %v144_v11 = vpop.f32.mrb[3].mxu0 }
 0x107   :  { %v112_v12 = vmax.f32 %v106_v7, %v111_v10 }
 0x109   :  { %113 = vst [vmem:[#allocation7] sm:$0xff] %v112_v12 }
 0x10a   :  { %209 = shalt.err (!%p206_p6)
}
 0x10b   :  { %s210_s15 = scalar_lea.hbm %s302_s3, 128 }
 0x10c   :  { %p211_p7 = scmp.ne.s32.totalorder %s302_s3, %s210_s15  ;;  %p214_p8 = scmp.lt.u32.totalorder %s210_s15, %s302_s3 }
 0x10e   :  { %p216_p9 = pnand %p214_p8, %p211_p7 }
 0x110   :  { %219 = shalt.err (!%p216_p9)
}
 0x111   :  { %123 = dma.vmem_to_hbm [thread:$0]  %s121_s12, 128, %s302_s3, [#allocation4]  }
 0x112   :  { %224 = dma.done.wait [#allocation4], 128  }
 0x113   :  { %225 = vsyncadd [#allocation4], 4294967168 }
 0x114   :  { %127 = vsyncpa [#allocation3], 1 }
 0x115   :  { %128 = vsyncpa [#allocation6], 1 }
 0x116   :  { %129 = vsyncpa [#allocation4], 1 }

</bundles_post_ra>
